<compile_context>
chip_gen: v6e
topology: v6e:2x2x1
jax: 0.10.0
libtpu: 0.0.40
codegen_flags: <defaults>
</compile_context>

<pallas_src>
import math
from functools import partial

import jax
import jax.numpy as jnp
from jax.experimental import pallas as pl
from jax.experimental.pallas import tpu as pltpu

_LANE = 128
_TARGET_BLOCK_BYTES = 2 * 1024 * 1024      # ~2 MiB data / block
_VMEM_LIMIT_BYTES = 32 * 1024 * 1024       # safe on v5e (128 MiB phys) and v7x (64 MiB phys)


def _sublane_pack(itemsize: int) -> int:
    """Rows per sublane-packing group: 8 for 4-byte, 16 for 2-byte, 32 for 1-byte."""
    return max(8, 8 * (4 // max(1, int(itemsize))))


# ---------------------------------------------------------------------------
# Aligned path: F % 128 == 0.  (B, R, 128) view, grid = (B, cdiv(R, tr)).
# x is left in HBM and DMA'd manually so dropped samples never read it.
# ---------------------------------------------------------------------------
def _dp_sample_kernel(scale_ref, x_hbm, o_ref, xbuf, sem, *, tr, tr_last):
    b = pl.program_id(0)
    r = pl.program_id(1)
    last_r = pl.num_programs(1) - 1
    s = scale_ref[b]                        # f32: 0.0 (dropped) or 1/keep_prob (kept)

    @pl.when(s != 0.0)
    def _kept():
        if tr_last == tr:                   # R % tr == 0: every row-block is full
            cp = pltpu.make_async_copy(
                x_hbm.at[b, pl.ds(r * tr, tr), :], xbuf, sem)
            cp.start()
            cp.wait()
        else:
            @pl.when(r != last_r)
            def _full_block():
                cp = pltpu.make_async_copy(
                    x_hbm.at[b, pl.ds(r * tr, tr), :], xbuf, sem)
                cp.start()
                cp.wait()

            @pl.when(r == last_r)
            def _tail_block():
                cp = pltpu.make_async_copy(
                    x_hbm.at[b, pl.ds(r * tr, tr_last), :],
                    xbuf.at[:tr_last], sem)
                cp.start()
                cp.wait()
        # Native-dtype multiply (bf16 VALU on v6e/v7x, f32 otherwise).  Rows
        # beyond tr_last in the tail block are junk but masked out of the HBM
        # writeback by Pallas' boundary handling.
        o_ref[...] = xbuf[...] * s.astype(o_ref.dtype)

    @pl.when(s == 0.0)
    def _dropped():
        o_ref[...] = jnp.zeros_like(o_ref)   # input DMA skipped entirely


def _drop_path_aligned(x3, scale, *, max_rows_per_block=None):
    B, R, _ = x3.shape
    itemsize = x3.dtype.itemsize
    pack = _sublane_pack(itemsize)

    # ~2 MiB data blocks (roofline plateau); 1 input scratch + 2x double-buffered
    # output ~= 3x block -> comfortably under v5e/v6e/v7x scoped-VMEM budgets.
    tr = max(pack, (_TARGET_BLOCK_BYTES // (_LANE * itemsize) // pack) * pack)
    if max_rows_per_block is not None:
        tr = max(pack, (int(max_rows_per_block) // pack) * pack)
    if R <= tr:
        tr = R                               # one block per sample (full-dim block)
    grid_r = pl.cdiv(R, tr)
    # v7x shards "parallel" grid axes across 2 TensorCores: ensure >= 2 points
    # even for batch-1 calls.
    if B * grid_r < 2 and R >= 2 * pack:
        tr = ((pl.cdiv(R, 2) + pack - 1) // pack) * pack
        grid_r = pl.cdiv(R, tr)
    tr_last = R - (grid_r - 1) * tr          # static row count of the last block

    kernel = partial(_dp_sample_kernel, tr=tr, tr_last=tr_last)
    return pl.pallas_call(
        kernel,
        out_shape=jax.ShapeDtypeStruct((B, R, _LANE), x3.dtype),
        grid_spec=pltpu.PrefetchScalarGridSpec(
            num_scalar_prefetch=1,                            # scale -> SMEM
            grid=(B, grid_r),
            in_specs=[pl.BlockSpec(memory_space=pl.ANY)],     # x stays in HBM
            out_specs=pl.BlockSpec((None, tr, _LANE),
                                   lambda b, r, scale: (b, r, 0)),
            scratch_shapes=[pltpu.VMEM((tr, _LANE), x3.dtype),
                            pltpu.SemaphoreType.DMA],
        ),
        compiler_params=pltpu.CompilerParams(
            dimension_semantics=("parallel", "parallel"),
            vmem_limit_bytes=_VMEM_LIMIT_BYTES),
    )(scale, x3)


# ---------------------------------------------------------------------------
# Ragged path: F % 128 != 0.  (B, F) view, blocks (B, tf) with tf % 128 == 0
# (or tf == F); the trailing partial lane block is masked by Pallas.  No pad,
# no slice, no extra HBM round trips.
# ---------------------------------------------------------------------------
def _dp_batch_kernel(scale_ref, x_ref, o_ref):
    o_ref[...] = x_ref[...] * scale_ref[...].astype(o_ref.dtype)


def _drop_path_ragged(xf, scale):
    B, F = xf.shape
    itemsize = xf.dtype.itemsize
    tf_cap = max(_LANE, (_TARGET_BLOCK_BYTES // (B * itemsize) // _LANE) * _LANE)
    if F <= tf_cap:
        tf = F
        if F >= 2 * _LANE:                   # give v7x's second core something to do
            tf = ((pl.cdiv(F, 2) + _LANE - 1) // _LANE) * _LANE
    else:
        tf = tf_cap
    grid_f = pl.cdiv(F, tf)

    return pl.pallas_call(
        _dp_batch_kernel,
        out_shape=jax.ShapeDtypeStruct((B, F), xf.dtype),
        grid=(grid_f,),
        in_specs=[pl.BlockSpec((B, 1), lambda j: (0, 0)),     # per-sample scale column
                  pl.BlockSpec((B, tf), lambda j: (0, j))],
        out_specs=pl.BlockSpec((B, tf), lambda j: (0, j)),
        compiler_params=pltpu.CompilerParams(
            dimension_semantics=("parallel",),
            vmem_limit_bytes=_VMEM_LIMIT_BYTES),
    )(scale.reshape(B, 1), xf)


# ---------------------------------------------------------------------------
# Public wrapper (matches drop_path(x, drop_prob, training) semantics).
# ---------------------------------------------------------------------------
def drop_path_pallas(x, u, drop_prob: float = 0.0, training: bool = False,
                     *, max_rows_per_block=None):
    """Pallas equivalent of drop_path(x, drop_prob, training).

    `u` is a (B,) array of uniform[0,1) randoms (the analogue of torch.rand).
    """
    if drop_prob == 0.0 or not training:
        return x
    if drop_prob >= 1.0:
        # torch reference divides by zero here (NaN); return the well-defined
        # limit of "drop every sample" instead.
        return jnp.zeros_like(x)

    keep_prob = 1.0 - float(drop_prob)
    B = x.shape[0]
    orig_shape = x.shape
    F = int(math.prod(x.shape[1:]))

    # Per-sample bernoulli mask folded with the 1/keep_prob rescale, in f32
    # (torch.rand-equivalent semantics independent of x.dtype).
    scale = (jnp.floor(keep_prob + u.astype(jnp.float32))
             * jnp.float32(1.0 / keep_prob))

    if F > 0 and F % _LANE == 0:
        x3 = x.reshape(B, F // _LANE, _LANE)
        out = _drop_path_aligned(x3, scale, max_rows_per_block=max_rows_per_block)
    else:
        xf = x.reshape(B, F)
        out = _drop_path_ragged(xf, scale)
    return out.reshape(orig_shape)


class DropPath:
    """Drop paths (Stochastic Depth) per sample — Pallas/JAX version."""

    def __init__(self, drop_prob=None):
        self.drop_prob = 0.0 if drop_prob is None else float(drop_prob)
        self.training = True

    def __call__(self, x, key):
        u = jax.random.uniform(key, (x.shape[0],), dtype=jnp.float32)
        return drop_path_pallas(x, u, self.drop_prob, self.training)


def _reference(x, u, drop_prob):
    keep = 1.0 - drop_prob
    mask = jnp.floor(keep + u.astype(jnp.float32))
    mask = mask.reshape((x.shape[0],) + (1,) * (x.ndim - 1))
    return ((x.astype(jnp.float32) / keep) * mask).astype(x.dtype)


if __name__ == "__main__":
    key = jax.random.PRNGKey(0)
    keys = jax.random.split(key, 8)
    drop_prob = 0.5

    # 1) NCHW-like f32 input, lane-aligned (F = 4*16*16 = 1024) -> aligned path.
    x = jax.random.normal(keys[0], (2, 4, 16, 16), dtype=jnp.float32)
    u = jax.random.uniform(keys[1], (2,), dtype=jnp.float32)
    out = jax.block_until_ready(drop_path_pallas(x, u, drop_prob, training=True))
    assert out.shape == x.shape and out.dtype == x.dtype
    assert jnp.allclose(out, _reference(x, u, drop_prob), atol=1e-6, rtol=1e-6)

    # 2) Token-like input with non-128-multiple feature size (F = 8*33 = 264)
    #    -> ragged path (no jnp.pad / slice copies).
    x2 = jax.random.normal(keys[2], (2, 8, 33), dtype=jnp.float32)
    u2 = jax.random.uniform(keys[3], (2,), dtype=jnp.float32)
    out2 = jax.block_until_ready(drop_path_pallas(x2, u2, drop_prob, training=True))
    assert jnp.allclose(out2, _reference(x2, u2, drop_prob), atol=1e-6, rtol=1e-6)

    # 3) Aligned path with several row-blocks and a partial last block
    #    (R = 17 rows, tr = 8 -> 1-row tail block via the static tail DMA).
    x3 = jax.random.normal(keys[4], (2, 17, 128), dtype=jnp.float32)
    u3 = jax.random.uniform(keys[5], (2,), dtype=jnp.float32)
    out3 = jax.block_until_ready(
        drop_path_pallas(x3, u3, drop_prob, training=True, max_rows_per_block=8))
    assert jnp.allclose(out3, _reference(x3, u3, drop_prob), atol=1e-6, rtol=1e-6)

    # 4) bf16 input (native bf16 multiply, 16-row sublane packing).
    xb = jax.random.normal(keys[6], (2, 8, 256), dtype=jnp.bfloat16)
    ub = jax.random.uniform(keys[7], (2,), dtype=jnp.float32)
    outb = jax.block_until_ready(drop_path_pallas(xb, ub, drop_prob, training=True))
    assert jnp.allclose(outb.astype(jnp.float32),
                        _reference(xb, ub, drop_prob).astype(jnp.float32),
                        atol=2e-2, rtol=2e-2)

    # 5) eval / p=0 identity and p>=1 guard.
    assert jnp.array_equal(drop_path_pallas(x, u, drop_prob, training=False), x)
    assert jnp.array_equal(drop_path_pallas(x, u, 0.0, training=True), x)
    assert jnp.array_equal(drop_path_pallas(x, u, 1.0, training=True),
                           jnp.zeros_like(x))

    # Module-level call.
    module = DropPath(drop_prob)
    module.training = True
    _ = jax.block_until_ready(module(x, keys[1]))

    print("KERNEL_OK")
</pallas_src>

<mosaic_0001>
module attributes {stable_mosaic.version = 11 : i64} {
  func.func @_dp_sample_kernel(%arg0: i32, %arg1: i32, %arg2: memref<2xf32, #tpu.memory_space<smem>>, %arg3: memref<2x8x128xf32, #tpu.memory_space<any>>, %arg4: memref<1x8x128xf32, #tpu.memory_space<vmem>>, %arg5: memref<8x128xf32, #tpu.memory_space<vmem>>, %arg6: memref<!tpu.dma_semaphore, #tpu.memory_space<semaphore_mem>>) attributes {dimension_semantics = [#tpu.dimension_semantics<parallel>, #tpu.dimension_semantics<parallel>], iteration_bounds = array<i64: 2, 1>, scalar_prefetch = 1 : i64, scratch_operands = 2 : i64, tpu.core_type = #tpu.core_type<tc>, window_params = [{}, {transform_indices = @transform_1, window_bounds = array<i64: 1, 8, 128>}]} {
    %0 = arith.index_cast %arg0 : i32 to index
    %1 = memref.load %arg2[%0] : memref<2xf32, #tpu.memory_space<smem>>
    %cst = arith.constant 0.000000e+00 : f32
    %2 = arith.cmpf one, %1, %cst : f32
    %3 = arith.extui %2 : i1 to i32
    %c0_i32 = arith.constant 0 : i32
    %4 = arith.cmpi ne, %3, %c0_i32 : i32
    scf.if %4 {
      %c8_i32 = arith.constant 8 : i32
      %8 = arith.muli %arg1, %c8_i32 : i32
      %c0_i32_2 = arith.constant 0 : i32
      %9 = tpu.memref_slice %arg3[%arg0, %8, %c0_i32_2] : memref<2x8x128xf32, #tpu.memory_space<any>> -> memref<1x8x128xf32, #tpu.memory_space<any>>
      %10 = tpu.memref_squeeze %9 : memref<1x8x128xf32, #tpu.memory_space<any>> -> memref<8x128xf32, #tpu.memory_space<any>>
      tpu.enqueue_dma source(%10 : memref<8x128xf32, #tpu.memory_space<any>>) target(%arg5 : memref<8x128xf32, #tpu.memory_space<vmem>>) target_semaphore(%arg6 : memref<!tpu.dma_semaphore, #tpu.memory_space<semaphore_mem>>)
      %c0_i32_3 = arith.constant 0 : i32
      %11 = tpu.memref_slice %arg3[%arg0, %8, %c0_i32_3] : memref<2x8x128xf32, #tpu.memory_space<any>> -> memref<1x8x128xf32, #tpu.memory_space<any>>
      %12 = tpu.memref_squeeze %11 : memref<1x8x128xf32, #tpu.memory_space<any>> -> memref<8x128xf32, #tpu.memory_space<any>>
      tpu.wait_dma2 semaphore(%arg6 : memref<!tpu.dma_semaphore, #tpu.memory_space<semaphore_mem>>) src(%12 : memref<8x128xf32, #tpu.memory_space<any>>) dst(%arg5 : memref<8x128xf32, #tpu.memory_space<vmem>>)
      %c0 = arith.constant 0 : index
      %c0_4 = arith.constant 0 : index
      %13 = vector.load %arg5[%c0, %c0_4] : memref<8x128xf32, #tpu.memory_space<vmem>>, vector<8x128xf32>
      %14 = vector.broadcast %1 : f32 to vector<8x128xf32>
      %15 = arith.mulf %13, %14 : vector<8x128xf32>
      %c0_5 = arith.constant 0 : index
      %c0_6 = arith.constant 0 : index
      %c0_7 = arith.constant 0 : index
      %16 = vector.load %arg4[%c0_5, %c0_6, %c0_7] : memref<1x8x128xf32, #tpu.memory_space<vmem>>, vector<1x8x128xf32>
      %17 = vector.shape_cast %16 : vector<1x8x128xf32> to vector<8x128xf32>
      %18 = vector.shape_cast %15 : vector<8x128xf32> to vector<1x8x128xf32>
      tpu.vector_store %arg4[%c0_5, %c0_6, %c0_7], %18 {strides = array<i32>} : memref<1x8x128xf32, #tpu.memory_space<vmem>>, vector<1x8x128xf32>,
    } else {
    }
    %cst_0 = arith.constant 0.000000e+00 : f32
    %5 = arith.cmpf oeq, %1, %cst_0 : f32
    %6 = arith.extui %5 : i1 to i32
    %c0_i32_1 = arith.constant 0 : i32
    %7 = arith.cmpi ne, %6, %c0_i32_1 : i32
    scf.if %7 {
      %cst_2 = arith.constant 0.000000e+00 : f32
      %8 = vector.broadcast %cst_2 : f32 to vector<8x128xf32>
      %c0 = arith.constant 0 : index
      %c0_3 = arith.constant 0 : index
      %c0_4 = arith.constant 0 : index
      %9 = vector.load %arg4[%c0, %c0_3, %c0_4] : memref<1x8x128xf32, #tpu.memory_space<vmem>>, vector<1x8x128xf32>
      %10 = vector.shape_cast %9 : vector<1x8x128xf32> to vector<8x128xf32>
      %11 = vector.shape_cast %8 : vector<8x128xf32> to vector<1x8x128xf32>
      tpu.vector_store %arg4[%c0, %c0_3, %c0_4], %11 {strides = array<i32>} : memref<1x8x128xf32, #tpu.memory_space<vmem>>, vector<1x8x128xf32>,
    } else {
    }
    return
  }
  func.func @transform_1(%arg0: i32, %arg1: i32, %arg2: memref<2xf32, #tpu.memory_space<smem>>) -> (i32, i32, i32) {
    %c0_i32 = arith.constant 0 : i32
    %c0_i32_0 = arith.constant 0 : i32
    return %arg0, %arg1, %c0_i32 : i32, i32, i32
  }
}

</mosaic_0001>

<bundles_post_ra>
// kernel: tpu_custom_call.1
= control target key start
LH: loop header
LB: loop body
LE: loop exit
PB: predicated region body
PF: predicated region fallthrough
CT: control target
= control target key end

     0   :  { %s320_s9 = smov [#allocation5]   ;;  %s423_s0 = inlined_call_operand.hbm [shape: f32[2], index: 0, kind: input, shape index: {}]   ;;  %s424_s1 = inlined_call_operand.hbm [shape: f32[2,8,128], index: 1, kind: input, shape index: {}]   ;;  %s425_s2 = inlined_call_operand.hbm [shape: f32[2,8,128], index: 2, kind: output, shape index: {}]  }
   0x1   :  { %8 = dma.hbm_to_smem %s423_s0, 16, %s320_s9, [#allocation4] }
   0x2   :  { %296 = dma.done.wait [#allocation4], 16 }
   0x3   :  { %297 = vsyncadd [#allocation4], 4294967280 }
   0x4   :  { %10 = sfence }
   0x5   :  { %11 = vsyncpa [#allocation7], 0 }
   0x6   :  { %13 = vsyncpa [#allocation7 + $0x1], 0  ;;  %s342_s12 = smov 0   ;;  %s344_s13 = smov 0  }
   0x7   :  { %s346_s14 = smov 0   ;;  %s348_s15 = smov 0  }
   0x8 LB: > { %s28_s0 = sadd.s32 1, %s314_s14  ;;  %s170_s16 = sadd.s32 4294967295, %s318_s15   ;;  %s318_s15 = sphi %s348_s15, %s19_s15   ;;  %s314_s14 = sphi %s346_s14, %s430_s14   ;;  %s310_s13 = sphi %s344_s13, %s429_s13   ;;  %s306_s12 = sphi %s342_s12, %s428_s12  }
   0x9   : > { %p30_p0 = scmp.ge.s32.totalorder %s28_s0, 2  ;;  %p46_p1 = scmp.ne.s32.totalorder %s310_s13, %s306_s12 }
   0xa   : > { %s37_s17 = sadd.s32 1, %s310_s13  ;;  %p47_p2 = scmp.eq.s32.totalorder %s170_s16, 1 }
   0xb   : > { %s432_s0 = smov (%p30_p0, %s28_s0), 0  ;;  %p41_p3 = scmp.eq.s32.totalorder %s318_s15, 1 }
   0xc   : > { %s32_s18 = ssub.s32 %s314_s14, %s432_s0  ;;  %p372_p6 = por %p47_p2, %p46_p1 }
   0xd   : > { %p35_p4 = scmp.eq.s32.totalorder %s32_s18, 0  ;;  %p171_p5 = scmp.ne.s32.totalorder %s32_s18, 0 }
   0xe   : > { %p172_p8 = scmp.ge.s32.totalorder %s318_s15, 2 }
   0xf   : > { %s377_s20 = scalar_select %p35_p4, %s310_s13, %s37_s17  }
  0x10   : > { %p379_p7 = por %p171_p5, %p41_p3  ;;  %56 = sbr.rel (%p172_p8) target bundleno = 61 (0x3d), region = 12 }
  0x11   : > { %s61_s22 = sand.u32 (!%p172_p8), 1, %s310_s13   ;;  %s64_s23 = sld [smem:[#allocation5 + %s314_s14]] (!%p172_p8) }
  0x12   : > { %s173_s24 = sshll.u32 (!%p172_p8), %s61_s22, 3 }
  0x13   : > { %s388_s25 = scalar_lea.vmem (!%p172_p8), [#allocation6], %s173_s24 }
  0x17   : > { %p65_p9 = scmp.ne.f32.partialorder %s64_s23, 0.0 }
  0x18   : > { %s181_s26 = sshll.u32 (%p65_p9), %s314_s14, 7  ;;  %s321_s30 = smov (%p65_p9), [#allocation2]  }
  0x19   : > { %68 = sbr.rel (!%p65_p9) target bundleno = 41 (0x29), region = 16  ;;  %s73_s29 = scalar_lea.hbm (%p65_p9), %s424_s1, %s181_s26 }
  0x1a   : > { %s81_s3 = sshll.u32 (%p65_p9), %s321_s30, 4  ;;  %s82_s3 = int_to_ptr.vmem [resolvable:$true] %s81_s3 }
  0x1b   : > { %s242_s4 = scalar_lea.vmem (%p65_p9), %s82_s3, 128  ;;  %p247_p11 = scmp.lt.s32.totalorder (%p65_p9), %s82_s3, %s82_s3 }
  0x1c   : > { %p243_p10 = scmp.ne.s32.totalorder (%p65_p9), %s82_s3, %s242_s4  ;;  %p248_p12 = scmp.lt.s32.totalorder (%p65_p9), %s242_s4, %s242_s4 }
  0x1e   : > { %p249_p13 = por %p248_p12, %p247_p11 }
  0x20   : > { %p250_p0 = pnand %p249_p13, %p243_p10 }
  0x22   : > { %253 = shalt.err (!%p250_p0)  }
  0x23   : > { %84 = dma.hbm_to_vmem [thread:$0]  %s73_s29, 128, %s82_s3, [#allocation3] }
  0x24   : > { %298 = dma.done.wait [#allocation3], 128 }
  0x25   : > { %299 = vsyncadd [#allocation3], 4294967168  ;;  %v89_v0 = vstv %s64_s23  ;;  %v88_v1 = vld [vmem:[#allocation2] sm:$0xff] }
  0x26   : > { %v90_v2 = vmul.f32 %v89_v0, %v88_v1 }
  0x28   : > { %91 = vst [vmem:[%s388_s25] sm:$0xff] %v90_v2 }
  0x29 PF: > { %p92_p1 = scmp.eq.f32.partialorder %s64_s23, 0.0 }
  0x2a   : > { %v322_v3 = vmov (%p92_p1), 0.0  }
  0x2b   : > { %95 = sbr.rel (!%p92_p1) target bundleno = 48 (0x30), region = 24  ;;  %96 = vst [vmem:[%s388_s25] sm:$0xff] (%p92_p1), %v322_v3 }
  0x30 PF: > { %s177_s5 = sshll.u32 %s314_s14, 7  ;;  %s112_s9 = sshll.u32 %s388_s25, 4  ;;  %s113_s9 = int_to_ptr.vmem [resolvable:$true] %s112_s9 }
  0x31   : > { %s110_s8 = scalar_lea.hbm %s425_s2, %s177_s5  ;;  %s98_s10 = scalar_lea.sflag [#allocation7], %s61_s22 }
  0x32   : > { %s254_s11 = scalar_lea.vmem %s113_s9, 128  ;;  %s323_s16 = smov [#allocation6]  }
  0x33   : > { %p255_p2 = scmp.ne.s32.totalorder %s113_s9, %s254_s11  ;;  %s258_s17 = sshll.u32 %s323_s16, 4  ;;  %s259_s17 = int_to_ptr.vmem [resolvable:$false] %s258_s17 }
  0x34   : > { %s260_s18 = scalar_lea.vmem %s259_s17, 256  ;;  %p261_p5 = scmp.lt.s32.totalorder %s113_s9, %s259_s17 }
  0x35   : > { %p256_p3 = pnand %p255_p2, %p379_p7  ;;  %p262_p8 = scmp.lt.s32.totalorder %s260_s18, %s254_s11 }
  0x37   : > { %p257_p4 = pneg %p256_p3  ;;  %p263_p9 = por %p262_p8, %p261_p5 }
  0x39   : > { %p264_p10 = pnand %p263_p9, %p257_p4 }
  0x3b   : > { %267 = shalt.err (!%p264_p10)
}
  0x3c   : > { %182 = dma.vmem_to_hbm [thread:$0]  (%p379_p7), %s113_s9, 128, %s110_s8, %s98_s10  }
  0x3d PF: > { %p188_p11 = scmp.ge.s32.totalorder %s318_s15, 1  ;;  %s124_s14 = sand.u32 1, %s306_s12  }
  0x3e   : > { %s125_s22 = scalar_lea.sflag [#allocation7], %s124_s14 }
  0x3f   : > { %p185_p12 = pnand %p188_p11, %p372_p6 }
  0x41   : > { %p186_p13 = pneg %p185_p12 }
  0x43   : > { %301 = dma.done.wait (%p186_p13), %s125_s22, 128  }
  0x44   : > { %303 = vsyncadd (%p186_p13), %s125_s22, 4294967168  ;;  %s19_s15 = sadd.s32 1, %s318_s15   ;;  %s428_s12 = smov %s310_s13 }
  0x45   : > { %p16_p0 = scmp.ge.s32.totalorder %s19_s15, 3   ;;  %s429_s13 = smov %s377_s20 }
  0x46   : > { %s430_s14 = smov %s432_s0 }
  0x47   :  { %18 = sbr.rel (!%p16_p0) target bundleno = 8 (0x8), region = 57 }
  0x4c   :  { %130 = vsyncpa [#allocation7], 1 }
  0x4d   :  { %132 = vsyncpa [#allocation7 + $0x1], 1 }
  0x4e   :  { %133 = vsyncmov [#allocation3] }
  0x51   :  { %s134_s19 = vpop.sfrf %133 }
  0x52   :  { %p180_p6 = scmp.ne.s32.totalorder %s134_s19, 0 }
  0x54   :  { %138 = shalt.err (%p180_p6)  }

</bundles_post_ra>
